<compile_context>
chip_gen: v6e
topology: v6e:2x2x1
jax: 0.10.0
libtpu: 0.0.40
codegen_flags: <defaults>
</compile_context>

<pallas_src>
import math
from functools import partial

import jax
import jax.numpy as jnp
from jax import lax
from jax.experimental import pallas as pl
from jax.experimental.pallas import tpu as pltpu


_CHUNK = 256  # lanes per inner chunk (multiple of 128); keeps h1+h2 in vregs


def _mlp_kernel(x_ref, w1_ref, b1_ref, w2_ref, b2_ref, w3_ref, b3_ref, o_ref,
                *, chunk, n_chunks):
    # Hoist weight/bias loads out of the chunk loop (VMEM-resident, ~9 KB,
    # a handful of vregs each).
    w1 = w1_ref[...]            # (32, 1)
    b1 = b1_ref[...]            # (32, 1)
    w2 = w2_ref[...]            # (64, 32)
    b2 = b2_ref[...]            # (64, 1)
    w3 = w3_ref[...]            # (2, 64)
    b3 = b3_ref[...]            # (2, 1)

    def body(c, carry):
        off = pl.multiple_of(c * chunk, chunk)
        xc = x_ref[:, pl.ds(off, chunk)]                         # (1, chunk)

        # Layer 1: Linear(1->32). K=1 contraction == broadcast outer product
        # on the VPU: (32,1)*(1,chunk) -> (32,chunk). Keeps the MXU free.
        h1 = jnp.tanh(w1 * xc + b1)                              # (32, chunk)

        # Layer 2: Linear(32->64) on the MXU: (64,32)@(32,chunk).
        h2 = jnp.tanh(
            jnp.dot(w2, h1, preferred_element_type=jnp.float32) + b2
        )                                                        # (64, chunk)

        # Layer 3: Linear(64->2): (2,64)@(64,chunk). Lane-dense store.
        o_ref[:, pl.ds(off, chunk)] = (
            jnp.dot(w3, h2, preferred_element_type=jnp.float32) + b3
        )                                                        # (2, chunk)
        return carry

    lax.fori_loop(0, n_chunks, body, 0, unroll=True)


def net_forward(x, params, *, max_tile_n=8192, chunk=_CHUNK):
    """x: (N, 1) float. params: W1,b1,W2,b2,W3,b3 in nn.Linear layout
    (W: (out, in), b: (out, 1)).  Returns (N, 2) float32."""
    assert chunk % 128 == 0, "chunk must be a multiple of 128 (lane width)"
    N = x.shape[0]

    w1, b1 = params["W1"], params["b1"]
    w2, b2 = params["W2"], params["b2"]
    w3, b3 = params["W3"], params["b3"]

    # Batch on lanes.
    xt = x.astype(jnp.float32).T                                 # (1, N)

    # --- adaptive tiling -------------------------------------------------
    # Pad only to a multiple of the 256-lane chunk (fine granularity), then
    # pick tile_n so the grid has >= 2 equal steps whenever there are >= 2
    # chunks (lets v7x shard the "parallel" axis across its two TCs) and at
    # most max_tile_n lanes per tile (amortizes ~0.35us/step overhead).
    chunks_total = pl.cdiv(N, chunk)
    max_chunks_per_tile = max(1, max_tile_n // chunk)
    if chunks_total <= 1:
        grid_steps = 1
    else:
        grid_steps = max(2, pl.cdiv(chunks_total, max_chunks_per_tile))
    chunks_total = pl.cdiv(chunks_total, grid_steps) * grid_steps
    chunks_per_tile = chunks_total // grid_steps
    tile_n = chunks_per_tile * chunk
    n_pad = chunks_total * chunk

    if n_pad != N:
        xt = jnp.pad(xt, ((0, 0), (0, n_pad - N)))

    # Weights / biases: full-array blocks, resident across all grid steps.
    def full(arr):
        return pl.BlockSpec(arr.shape, lambda i: (0, 0))

    kernel = partial(_mlp_kernel, chunk=chunk, n_chunks=chunks_per_tile)

    out_t = pl.pallas_call(
        kernel,
        out_shape=jax.ShapeDtypeStruct((2, n_pad), jnp.float32),
        grid_spec=pltpu.PrefetchScalarGridSpec(
            num_scalar_prefetch=0,
            grid=(grid_steps,),
            in_specs=[
                pl.BlockSpec((1, tile_n), lambda i: (0, i)),     # x tile
                full(w1), full(b1),
                full(w2), full(b2),
                full(w3), full(b3),
            ],
            out_specs=pl.BlockSpec((2, tile_n), lambda i: (0, i)),
        ),
        compiler_params=pltpu.CompilerParams(
            dimension_semantics=("parallel",),  # megacore-shardable on v7x
        ),
    )(xt, w1, b1, w2, b2, w3, b3)

    # Slice off padded columns first, then transpose back to (N, 2).
    # TODO(synk): if the consumer can accept the (2, N) layout directly, the
    #             wrapper transpose (an extra HBM round trip) can be dropped.
    return out_t[:, :N].T                                        # (N, 2)


def init_params(key):
    """Deterministic init mimicking nn.Linear (uniform +/- 1/sqrt(fan_in)).
    Weights stored as (out, in), biases as (out, 1) to match the kernel."""
    ks = jax.random.split(key, 6)

    def linear(kw, kb, fan_in, fan_out):
        bound = 1.0 / math.sqrt(fan_in)
        W = jax.random.uniform(kw, (fan_out, fan_in), jnp.float32, -bound, bound)
        b = jax.random.uniform(kb, (fan_out, 1), jnp.float32, -bound, bound)
        return W, b

    W1, b1 = linear(ks[0], ks[1], 1, 32)
    W2, b2 = linear(ks[2], ks[3], 32, 64)
    W3, b3 = linear(ks[4], ks[5], 64, 2)
    return {"W1": W1, "b1": b1, "W2": W2, "b2": b2, "W3": W3, "b3": b3}


def reference_forward(x, p):
    x = x.astype(jnp.float32)
    h1 = jnp.tanh(x @ p["W1"].T + p["b1"].T)
    h2 = jnp.tanh(h1 @ p["W2"].T + p["b2"].T)
    return h2 @ p["W3"].T + p["b3"].T


if __name__ == "__main__":
    key = jax.random.PRNGKey(0)
    kp, kx = jax.random.split(key)
    params = init_params(kp)

    # N not a multiple of the chunk on purpose: exercises the pad path and
    # yields a 2-step "parallel" grid (1000 -> 1024 lanes, 2 tiles of 512).
    N = 1000
    x = jax.random.normal(kx, (N, 1), jnp.float32)

    out = jax.block_until_ready(net_forward(x, params))
    ref = reference_forward(x, params)
    assert out.shape == (N, 2)
    assert jnp.allclose(out, ref, atol=1e-5, rtol=1e-5)

    # Tiny batch: single-chunk, single-grid-step path.
    x_small = jax.random.normal(kx, (3, 1), jnp.float32)
    out_small = jax.block_until_ready(net_forward(x_small, params))
    assert out_small.shape == (3, 2)
    assert jnp.allclose(out_small, reference_forward(x_small, params),
                        atol=1e-5, rtol=1e-5)

    print("KERNEL_OK")
</pallas_src>

<mosaic_0001>
module attributes {stable_mosaic.version = 11 : i64} {
  func.func @_mlp_kernel(%arg0: i32, %arg1: memref<1x512xf32, #tpu.memory_space<vmem>>, %arg2: memref<32x1xf32, #tpu.memory_space<vmem>>, %arg3: memref<32x1xf32, #tpu.memory_space<vmem>>, %arg4: memref<64x32xf32, #tpu.memory_space<vmem>>, %arg5: memref<64x1xf32, #tpu.memory_space<vmem>>, %arg6: memref<2x64xf32, #tpu.memory_space<vmem>>, %arg7: memref<2x1xf32, #tpu.memory_space<vmem>>, %arg8: memref<2x512xf32, #tpu.memory_space<vmem>>) attributes {dimension_semantics = [#tpu.dimension_semantics<parallel>], iteration_bounds = array<i64: 2>, scalar_prefetch = 0 : i64, scratch_operands = 0 : i64, tpu.core_type = #tpu.core_type<tc>, window_params = [{transform_indices = @transform_0, window_bounds = array<i64: 1, 512>}, {pipeline_mode = #tpu.pipeline_mode<synchronous>, transform_indices = @transform_1, window_bounds = array<i64: 32, 1>}, {pipeline_mode = #tpu.pipeline_mode<synchronous>, transform_indices = @transform_2, window_bounds = array<i64: 32, 1>}, {pipeline_mode = #tpu.pipeline_mode<synchronous>, transform_indices = @transform_3, window_bounds = array<i64: 64, 32>}, {pipeline_mode = #tpu.pipeline_mode<synchronous>, transform_indices = @transform_4, window_bounds = array<i64: 64, 1>}, {pipeline_mode = #tpu.pipeline_mode<synchronous>, transform_indices = @transform_5, window_bounds = array<i64: 2, 64>}, {pipeline_mode = #tpu.pipeline_mode<synchronous>, transform_indices = @transform_6, window_bounds = array<i64: 2, 1>}, {transform_indices = @transform_7, window_bounds = array<i64: 2, 512>}]} {
    %c0 = arith.constant 0 : index
    %c0_0 = arith.constant 0 : index
    %0 = vector.load %arg2[%c0, %c0_0] : memref<32x1xf32, #tpu.memory_space<vmem>>, vector<32x1xf32>
    %c0_1 = arith.constant 0 : index
    %c0_2 = arith.constant 0 : index
    %1 = vector.load %arg3[%c0_1, %c0_2] : memref<32x1xf32, #tpu.memory_space<vmem>>, vector<32x1xf32>
    %c0_3 = arith.constant 0 : index
    %c0_4 = arith.constant 0 : index
    %2 = vector.load %arg4[%c0_3, %c0_4] : memref<64x32xf32, #tpu.memory_space<vmem>>, vector<64x32xf32>
    %c0_5 = arith.constant 0 : index
    %c0_6 = arith.constant 0 : index
    %3 = vector.load %arg5[%c0_5, %c0_6] : memref<64x1xf32, #tpu.memory_space<vmem>>, vector<64x1xf32>
    %c0_7 = arith.constant 0 : index
    %c0_8 = arith.constant 0 : index
    %4 = vector.load %arg6[%c0_7, %c0_8] : memref<2x64xf32, #tpu.memory_space<vmem>>, vector<2x64xf32>
    %c0_9 = arith.constant 0 : index
    %c0_10 = arith.constant 0 : index
    %5 = vector.load %arg7[%c0_9, %c0_10] : memref<2x1xf32, #tpu.memory_space<vmem>>, vector<2x1xf32>
    %c0_i32 = arith.constant 0 : i32
    %c256_i32 = arith.constant 256 : i32
    %6 = arith.muli %c0_i32, %c256_i32 : i32
    %7 = tpu.assume_multiple %6, 256 : i32
    %c0_11 = arith.constant 0 : index
    %8 = arith.index_cast %7 : i32 to index
    %9 = vector.load %arg1[%c0_11, %8] : memref<1x512xf32, #tpu.memory_space<vmem>>, vector<1x256xf32>
    %10 = vector.broadcast %0 : vector<32x1xf32> to vector<32x256xf32>
    %11 = vector.broadcast %9 : vector<1x256xf32> to vector<32x256xf32>
    %12 = arith.mulf %10, %11 : vector<32x256xf32>
    %13 = vector.broadcast %1 : vector<32x1xf32> to vector<32x256xf32>
    %14 = arith.addf %12, %13 : vector<32x256xf32>
    %15 = math.tanh %14 : vector<32x256xf32>
    %cst = arith.constant dense<0.000000e+00> : vector<64x256xf32>
    %16 = tpu.matmul %2, %15, %cst {dimension_numbers = #tpu.dot_dimension_numbers<[1], [0], [0], [1], [0, 0, 1, 1], [], []>} : vector<64x32xf32>, vector<32x256xf32>, vector<64x256xf32> -> vector<64x256xf32>
    %17 = vector.broadcast %3 : vector<64x1xf32> to vector<64x256xf32>
    %18 = arith.addf %16, %17 : vector<64x256xf32>
    %19 = math.tanh %18 : vector<64x256xf32>
    %cst_12 = arith.constant dense<0.000000e+00> : vector<2x256xf32>
    %20 = tpu.matmul %4, %19, %cst_12 {dimension_numbers = #tpu.dot_dimension_numbers<[1], [0], [0], [1], [0, 0, 1, 1], [], []>} : vector<2x64xf32>, vector<64x256xf32>, vector<2x256xf32> -> vector<2x256xf32>
    %21 = vector.broadcast %5 : vector<2x1xf32> to vector<2x256xf32>
    %22 = arith.addf %20, %21 : vector<2x256xf32>
    %c0_13 = arith.constant 0 : index
    %23 = arith.index_cast %7 : i32 to index
    %24 = vector.load %arg8[%c0_13, %23] : memref<2x512xf32, #tpu.memory_space<vmem>>, vector<2x256xf32>
    tpu.vector_store %arg8[%c0_13, %23], %22 {strides = array<i32>} : memref<2x512xf32, #tpu.memory_space<vmem>>, vector<2x256xf32>,
    %c1_i32 = arith.constant 1 : i32
    %c256_i32_14 = arith.constant 256 : i32
    %25 = arith.muli %c1_i32, %c256_i32_14 : i32
    %26 = tpu.assume_multiple %25, 256 : i32
    %c0_15 = arith.constant 0 : index
    %27 = arith.index_cast %26 : i32 to index
    %28 = vector.load %arg1[%c0_15, %27] : memref<1x512xf32, #tpu.memory_space<vmem>>, vector<1x256xf32>
    %29 = vector.broadcast %0 : vector<32x1xf32> to vector<32x256xf32>
    %30 = vector.broadcast %28 : vector<1x256xf32> to vector<32x256xf32>
    %31 = arith.mulf %29, %30 : vector<32x256xf32>
    %32 = vector.broadcast %1 : vector<32x1xf32> to vector<32x256xf32>
    %33 = arith.addf %31, %32 : vector<32x256xf32>
    %34 = math.tanh %33 : vector<32x256xf32>
    %cst_16 = arith.constant dense<0.000000e+00> : vector<64x256xf32>
    %35 = tpu.matmul %2, %34, %cst_16 {dimension_numbers = #tpu.dot_dimension_numbers<[1], [0], [0], [1], [0, 0, 1, 1], [], []>} : vector<64x32xf32>, vector<32x256xf32>, vector<64x256xf32> -> vector<64x256xf32>
    %36 = vector.broadcast %3 : vector<64x1xf32> to vector<64x256xf32>
    %37 = arith.addf %35, %36 : vector<64x256xf32>
    %38 = math.tanh %37 : vector<64x256xf32>
    %cst_17 = arith.constant dense<0.000000e+00> : vector<2x256xf32>
    %39 = tpu.matmul %4, %38, %cst_17 {dimension_numbers = #tpu.dot_dimension_numbers<[1], [0], [0], [1], [0, 0, 1, 1], [], []>} : vector<2x64xf32>, vector<64x256xf32>, vector<2x256xf32> -> vector<2x256xf32>
    %40 = vector.broadcast %5 : vector<2x1xf32> to vector<2x256xf32>
    %41 = arith.addf %39, %40 : vector<2x256xf32>
    %c0_18 = arith.constant 0 : index
    %42 = arith.index_cast %26 : i32 to index
    %43 = vector.load %arg8[%c0_18, %42] : memref<2x512xf32, #tpu.memory_space<vmem>>, vector<2x256xf32>
    tpu.vector_store %arg8[%c0_18, %42], %41 {strides = array<i32>} : memref<2x512xf32, #tpu.memory_space<vmem>>, vector<2x256xf32>,
    %c2_i32 = arith.constant 2 : i32
    return
  }
  func.func @transform_0(%arg0: i32) -> (i32, i32) {
    %c0_i32 = arith.constant 0 : i32
    %c0_i32_0 = arith.constant 0 : i32
    return %c0_i32, %arg0 : i32, i32
  }
  func.func @transform_1(%arg0: i32) -> (i32, i32) {
    %c0_i32 = arith.constant 0 : i32
    %c0_i32_0 = arith.constant 0 : i32
    %c0_i32_1 = arith.constant 0 : i32
    return %c0_i32, %c0_i32_0 : i32, i32
  }
  func.func @transform_2(%arg0: i32) -> (i32, i32) {
    %c0_i32 = arith.constant 0 : i32
    %c0_i32_0 = arith.constant 0 : i32
    %c0_i32_1 = arith.constant 0 : i32
    return %c0_i32, %c0_i32_0 : i32, i32
  }
  func.func @transform_3(%arg0: i32) -> (i32, i32) {
    %c0_i32 = arith.constant 0 : i32
    %c0_i32_0 = arith.constant 0 : i32
    %c0_i32_1 = arith.constant 0 : i32
    return %c0_i32, %c0_i32_0 : i32, i32
  }
  func.func @transform_4(%arg0: i32) -> (i32, i32) {
    %c0_i32 = arith.constant 0 : i32
    %c0_i32_0 = arith.constant 0 : i32
    %c0_i32_1 = arith.constant 0 : i32
    return %c0_i32, %c0_i32_0 : i32, i32
  }
  func.func @transform_5(%arg0: i32) -> (i32, i32) {
    %c0_i32 = arith.constant 0 : i32
    %c0_i32_0 = arith.constant 0 : i32
    %c0_i32_1 = arith.constant 0 : i32
    return %c0_i32, %c0_i32_0 : i32, i32
  }
  func.func @transform_6(%arg0: i32) -> (i32, i32) {
    %c0_i32 = arith.constant 0 : i32
    %c0_i32_0 = arith.constant 0 : i32
    %c0_i32_1 = arith.constant 0 : i32
    return %c0_i32, %c0_i32_0 : i32, i32
  }
  func.func @transform_7(%arg0: i32) -> (i32, i32) {
    %c0_i32 = arith.constant 0 : i32
    %c0_i32_0 = arith.constant 0 : i32
    return %c0_i32, %arg0 : i32, i32
  }
}

</mosaic_0001>

<bundles_post_ra>
// kernel: tpu_custom_call.1
= control target key start
LH: loop header
LB: loop body
LE: loop exit
PB: predicated region body
PF: predicated region fallthrough
CT: control target
= control target key end

     0   :  { %12 = vsyncpa [#allocation3], 0  ;;  %s1591_s0 = inlined_call_operand.vmem [shape: f32[1,1024], index: 0, kind: input, shape index: {}]   ;;  %s1592_s1 = inlined_call_operand.vmem [shape: f32[32,1], index: 1, kind: input, shape index: {}]   ;;  %s1593_s2 = inlined_call_operand.vmem [shape: f32[32,1], index: 2, kind: input, shape index: {}]   ;;  %s1594_s3 = inlined_call_operand.vmem [shape: f32[64,32], index: 3, kind: input, shape index: {}]   ;;  %s1595_s4 = inlined_call_operand.vmem [shape: f32[64,1], index: 4, kind: input, shape index: {}]   ;;  %s1596_s5 = inlined_call_operand.vmem [shape: f32[2,64], index: 5, kind: input, shape index: {}]   ;;  %s1597_s6 = inlined_call_operand.vmem [shape: f32[2,1], index: 6, kind: input, shape index: {}]   ;;  %s1598_s7 = inlined_call_operand.hbm [shape: f32[2,1024], index: 7, kind: output, shape index: {}]  }
   0x1   :  { %14 = vsyncpa [#allocation3 + $0x1], 0  ;;  %s1264_s24 = smov 0   ;;  %s1266_s25 = smov 0  }
   0x2   :  { %s1268_s26 = smov 0   ;;  %s1270_s27 = smov 0  }
   0x3 LB: > { %s1285_s28 = sadd.s32 4294967295, %s1219_s27   ;;  %s986_s29 = sadd.s32 4294967294, %s1219_s27   ;;  %s1219_s27 = sphi %s1270_s27, %s1604_s27   ;;  %s1215_s26 = sphi %s1268_s26, %s1603_s26   ;;  %s1211_s25 = sphi %s1266_s25, %s1602_s25   ;;  %s1207_s24 = sphi %s1264_s24, %s1601_s24  }
   0x4   : > { %s1289_s30 = sadd.s32 1, %s1219_s27   ;;  %s179_s8 = sadd.s32 1, %s1215_s26 }
   0x5   : > { %s176_s9 = ssub.s32 %s1219_s27, %s1289_s30  ;;  %p189_p0 = scmp.ne.s32.totalorder %s1215_s26, %s1211_s25 }
   0x6   : > { %p177_p1 = scmp.eq.s32.totalorder %s176_s9, 0  ;;  %p190_p2 = scmp.eq.s32.totalorder %s1285_s28, 1 }
   0x7   : > { %p195_p3 = scmp.ne.s32.totalorder %s1211_s25, %s1207_s24  ;;  %p196_p4 = scmp.eq.s32.totalorder %s986_s29, 1 }
   0x8   : > { %s1300_s10 = scalar_select %p177_p1, %s1215_s26, %s179_s8  }
   0x9   : > { %p1302_p5 = por %p190_p2, %p189_p0  ;;  %p1306_p6 = por %p196_p4, %p195_p3 }
   0xa   : > { %p989_p7 = scmp.ge.s32.totalorder %s1219_s27, 1  ;;  %p240_p8 = scmp.lt.s32.totalorder %s1219_s27, 3 }
   0xc   : > { %p241_p9 = pnand %p989_p7, %p240_p8 }
   0xd   : > { %s991_s17 = sshll.u32 (!%p241_p9), %s1285_s28, 2  ;;  %s268_s14 = sand.u32 (!%p241_p9), 1, %s1211_s25  }
   0xe   : > { %244 = sbr.rel (%p241_p9) target bundleno = 908 (0x38c), region = 48  ;;  %p272_p10 = scmp.lt.s32.totalorder (!%p241_p9), %s991_s17, 7 }
   0xf   : > { %s990_s15 = sshll.u32 (!%p241_p9), %s268_s14, 3  ;;  %s916_s22 = scalar_lea.sflag (!%p241_p9), [#allocation3], %s268_s14 }
  0x10   : > { %s1531_s16 = scalar_lea.vmem (!%p241_p9), [#allocation2], %s990_s15 }
  0x11   : > { %s930_s18 = sshll.u32 (!%p241_p9), %s1531_s16, 4  ;;  %s931_s18 = int_to_ptr.vmem [resolvable:$true] %s930_s18 }
  0x12   : > { %s1159_s23 = scalar_lea.vmem (!%p241_p9), %s931_s18, 128 }
  0x13   : > { %v284_v0 = vld [vmem:[%s1593_s2 + $0x18] sm:$0xff]  ;;  %v325_v2 = vlaneseq  ;;  %v1221_v3 = vmov 0   ;;  %v279_v5 = vld [vmem:[%s1592_s1 + $0x10] sm:$0xff]  ;;  %v278_v6 = vld [vmem:[%s1592_s1 + $0x8] sm:$0xff]  ;;  %s1606_s17 = smov (!%p272_p10, %s991_s17), 7  ;;  %v1222_v25 = vmov 0.0   ;;  %p1160_p11 = scmp.ne.s32.totalorder %s931_s18, %s1159_s23 }
  0x14   : > { %v280_v1 = vld [vmem:[%s1592_s1 + $0x18] sm:$0xff]  ;;  %1062 = vset.pattern.permute.xlu1 %v1221_v3  ;;  %1061 = vset.pattern.permute.xlu0 %v1221_v3  ;;  %s1328_s29 = scalar_lea.vmem %s1591_s0, %s1606_s17  ;;  %v283_v10 = vld [vmem:[%s1593_s2 + $0x10] sm:$0xff]  ;;  %v277_v11 = vld [vmem:[%s1592_s1] sm:$0xff]  ;;  %vm419_vm0 = vcmask 261120   ;;  %vm578_vm1 = vcmask 523264   ;;  %s1019_s17 = sshll.u32 %s1285_s28, 7 }
  0x15   : > { %360 = vperm.xlu1 %1062, %v284_v0   ;;  %321 = vperm.xlu0 %1061, %v280_v1   ;;  %v326_v4 = vshrl.u32 %v325_v2, 7  ;;  %v1002_v9 = vld [vmem:[%s1328_s29 + $0x2] sm:$0x3]  ;;  %v282_v14 = vld [vmem:[%s1593_s2 + $0x8] sm:$0xff]  ;;  %v300_v16 = vld [vmem:[%s1595_s4 + $0x38] sm:$0xff]  ;;  %s928_s21 = scalar_lea.hbm %s1598_s7, %s1019_s17  ;;  %p1161_p12 = pnand %p1160_p11, %p1302_p5 }
  0x16   : > { %v281_v15 = vld [vmem:[%s1593_s2] sm:$0xff]  ;;  %v299_v17 = vld [vmem:[%s1595_s4 + $0x30] sm:$0xff]  ;;  %v298_v18 = vld [vmem:[%s1595_s4 + $0x28] sm:$0xff]  ;;  %508 = vmatprep.mubr.f32.mxu0 %v1222_v25  ;;  %646 = vmatprep.mubr.f32.mxu1 %v1222_v25  ;;  %s1223_s28 = smov [#allocation2]  }
  0x17   : > { %v327_v7 = vsub.s32 0, %v326_v4  ;;  %v331_v8 = vsub.s32 1, %v326_v4  ;;  %v297_v19 = vld [vmem:[%s1595_s4 + $0x20] sm:$0xff]  ;;  %v296_v20 = vld [vmem:[%s1595_s4 + $0x18] sm:$0xff]  ;;  %v295_v21 = vld [vmem:[%s1595_s4 + $0x10] sm:$0xff]  ;;  %p1162_p13 = pneg %p1161_p12 }
  0x18   : > { %v294_v22 = vld [vmem:[%s1595_s4 + $0x8] sm:$0xff]  ;;  %v293_v23 = vld [vmem:[%s1595_s4] sm:$0xff] }
  0x19   : > { %316 = vperm.xlu0 %1061, %v279_v5   ;;  %311 = vperm.xlu1 %1062, %v278_v6   ;;  %v671_v12 = vrot.slane %v1002_v9, %v327_v7  ;;  %v675_v13 = vrot.slane %v1002_v9, %v331_v8  ;;  %v302_v24 = vld [vmem:[%s1597_s6] sm:$0x3] }
  0x1a   : > { %v303_v26 = vld [vmem:[%s1328_s29] sm:$0x3]  ;;  %s1163_s29 = sshll.u32 %s1223_s28, 4  ;;  %s1164_s29 = int_to_ptr.vmem [resolvable:$false] %s1163_s29 }
  0x1b   : > { %v328_v27 = vrot.slane %v303_v26, %v327_v7  ;;  %v332_v28 = vrot.slane %v303_v26, %v331_v8  ;;  %s1165_s8 = scalar_lea.vmem %s1164_s29, 256  ;;  %p1166_p0 = scmp.lt.s32.totalorder %s931_s18, %s1164_s29 }
  0x1c   : > { %p1167_p1 = scmp.lt.s32.totalorder %s1165_s8, %s1159_s23 }
  0x1d   : > { %355 = vperm.xlu0 %1061, %v283_v10   ;;  %306 = vperm.xlu1 %1062, %v277_v11  }
  0x1e   : > { %p1168_p2 = por %p1167_p1, %p1166_p0 }
  0x20   : > { %p1169_p3 = pnand %p1168_p2, %p1162_p13 }
  0x21   : > { %350 = vperm.xlu0 %1061, %v282_v14   ;;  %345 = vperm.xlu1 %1062, %v281_v15   ;;  %v1400_v14 = vld [vmem:[%s1594_s3 + $0x8] sm:$0xff]  ;;  %v1408_v15 = vld [vmem:[%s1594_s3 + $0x10] sm:$0xff] }
  0x25   : > { %416 = vperm.xlu0 %1061, %v300_v16   ;;  %411 = vperm.xlu1 %1062, %v299_v17   ;;  %v1416_v16 = vld [vmem:[%s1594_s3 + $0x18] sm:$0xff]  ;;  %v1424_v17 = vld [vmem:[%s1594_s3 + $0x20] sm:$0xff] }
  0x29   : > { %406 = vperm.xlu0 %1061, %v298_v18   ;;  %401 = vperm.xlu1 %1062, %v297_v19   ;;  %v1432_v18 = vld [vmem:[%s1594_s3 + $0x28] sm:$0xff]  ;;  %v1440_v19 = vld [vmem:[%s1594_s3 + $0x30] sm:$0xff] }
  0x2d   : > { %396 = vperm.xlu0 %1061, %v296_v20   ;;  %391 = vperm.xlu1 %1062, %v295_v21   ;;  %v1448_v20 = vld [vmem:[%s1594_s3 + $0x38] sm:$0xff] }
  0x31   : > { %386 = vperm.xlu0 %1061, %v294_v22   ;;  %381 = vperm.xlu1 %1062, %v293_v23  }
  0x35   : > { %575 = vperm.xlu0 %1061, %v302_v24  }
  0x90   : > { %v361_v29 = vpop.permute.xlu1 %360  ;;  %v322_v30 = vpop.permute.xlu0 %321 }
  0x91   : > { %v341_v31 = vmul.f32 %v328_v27, %v322_v30  ;;  %v684_v32 = vmul.f32 %v671_v12, %v322_v30  ;;  %v685_v33 = vmul.f32 %v675_v13, %v322_v30  ;;  %v342_v34 = vmul.f32 %v332_v28, %v322_v30 }
  0x93   : > { %v369_v35 = vadd.f32 %v361_v29, %v341_v31  ;;  %v1373_v36 = vadd.f32 %v684_v32, %v361_v29  ;;  %v1375_v37 = vadd.f32 %v685_v33, %v361_v29  ;;  %v370_v40 = vadd.f32 %v361_v29, %v342_v34 }
  0x94   : > { %v317_v38 = vpop.permute.xlu0 %316  ;;  %v312_v39 = vpop.permute.xlu1 %311 }
  0x95   : > { %v682_v41 = vmul.f32 %v671_v12, %v317_v38  ;;  %1063 = vtanh.f32 %v369_v35  ;;  %v683_v42 = vmul.f32 %v675_v13, %v317_v38  ;;  %v339_v43 = vmul.f32 %v328_v27, %v317_v38 }
  0x96   : > { %v340_v44 = vmul.f32 %v332_v28, %v317_v38  ;;  %v680_v45 = vmul.f32 %v671_v12, %v312_v39  ;;  %v681_v46 = vmul.f32 %v675_v13, %v312_v39  ;;  %1065 = vtanh.f32 %v370_v40 }
  0x97   : > { %v337_v55 = vmul.f32 %v328_v27, %v312_v39  ;;  %v338_v56 = vmul.f32 %v332_v28, %v312_v39 }
  0x98   : > { %v356_v47 = vpop.permute.xlu0 %355  ;;  %v307_v48 = vpop.permute.xlu1 %306 }
  0x99   : > { %v367_v49 = vadd.f32 %v356_v47, %v339_v43  ;;  %v368_v50 = vadd.f32 %v356_v47, %v340_v44  ;;  %v1377_v51 = vadd.f32 %v682_v41, %v356_v47  ;;  %v1379_v52 = vadd.f32 %v683_v42, %v356_v47 }
  0x9a   : > { %v678_v53 = vmul.f32 %v671_v12, %v307_v48  ;;  %v679_v54 = vmul.f32 %v675_v13, %v307_v48  ;;  %v336_v62 = vmul.f32 %v332_v28, %v307_v48  ;;  %v335_v0 = vmul.f32 %v328_v27, %v307_v48  ;;  %v1392_v12 = vld [vmem:[%s1594_s3] sm:$0xff] }
  0x9b   : > { %1067 = vtanh.f32 %v367_v49 }
  0x9c   : > { %1069 = vtanh.f32 %v368_v50  ;;  %v351_v57 = vpop.permute.xlu0 %350  ;;  %v346_v58 = vpop.permute.xlu1 %345 }
  0x9d   : > { %v365_v59 = vadd.f32 %v351_v57, %v337_v55  ;;  %v366_v60 = vadd.f32 %v351_v57, %v338_v56  ;;  %v1381_v61 = vadd.f32 %v680_v45, %v351_v57  ;;  %v1383_v63 = vadd.f32 %v681_v46, %v351_v57 }
  0x9e   : > { %v1385_v1 = vadd.f32 %v678_v53, %v346_v58  ;;  %v1387_v2 = vadd.f32 %v679_v54, %v346_v58  ;;  %v364_v3 = vadd.f32 %v346_v58, %v336_v62  ;;  %v363_v4 = vadd.f32 %v346_v58, %v335_v0 }
  0x9f   : > { %1071 = vtanh.f32 %v365_v59 }
  0xa0   : > { %1073 = vtanh.f32 %v366_v60  ;;  %v1453_v33 = vpop.permute.xlu0 %416  ;;  %v1455_v35 = vpop.permute.xlu1 %411 }
  0xa1   : > { %1075 = vtanh.f32 %v364_v3 }
  0xa2   : > { %v1064_v5 = vpop.eup %1063  ;;  %1077 = vtanh.f32 %v363_v4 }
  0xa3   : > { %v1066_v6 = vpop.eup %1065 }
  0xa4   : > { %468 = vmatprep.subr.mxu0 %v1066_v6  ;;  %v1457_v40 = vpop.permute.xlu0 %406  ;;  %v1459_v42 = vpop.permute.xlu1 %401 }
  0xa5   : > { %469 = vmatpush1.msra.mxu0 %v1064_v5 }
  0xa8   : > { %v1068_v7 = vpop.eup %1067  ;;  %v1466_v49 = vpop.permute.xlu0 %396 }
  0xa9   : > { %v1070_v8 = vpop.eup %1069  ;;  %v1470_v54 = vpop.permute.xlu1 %391 }
  0xaa   : > { %470 = vmatprep.subr.mxu0 %v1070_v8 }
  0xab   : > { %471 = vmatpush1.msra.mxu0 %v1068_v7 }
  0xac   : > { %v1072_v9 = vpop.eup %1071  ;;  %v1476_v59 = vpop.permute.xlu0 %386 }
  0xad   : > { %v1074_v10 = vpop.eup %1073  ;;  %v1480_v0 = vpop.permute.xlu1 %381 }
  0xae   : > { %472 = vmatprep.subr.mxu0 %v1074_v10  ;;  %v1076_v11 = vpop.eup %1075 }
  0xaf   : > { %473 = vmatpush1.msra.mxu0 %v1072_v9  ;;  %v1078_v13 = vpop.eup %1077 }
  0xb0   : > { %474 = vmatprep.subr.mxu0 %v1076_v11 }
  0xb1   : > { %475 = vmatpush1.msra.mxu0 %v1078_v13 }
  0xb2   : > { %992 = vmatmul.mubr.msk.f32.vlgmr.msra.gmra.mxu0 %vm419_vm0, %v1392_v12 }
  0xb3   : > { %514 = vmatprep.mubr.f32.mxu0 %v1222_v25 }
  0xb6   : > { %993 = vmatmul.mubr.msk.f32.gmra.mxu0 %vm419_vm0, %v1400_v14 }
  0xb7   : > { %520 = vmatprep.mubr.f32.mxu0 %v1222_v25 }
  0xba   : > { %994 = vmatmul.mubr.msk.f32.gmra.mxu0 %vm419_vm0, %v1408_v15 }
  0xbb   : > { %526 = vmatprep.mubr.f32.mxu0 %v1222_v25 }
  0xbe   : > { %995 = vmatmul.mubr.msk.f32.gmra.mxu0 %vm419_vm0, %v1416_v16 }
  0xbf   : > { %532 = vmatprep.mubr.f32.mxu0 %v1222_v25 }
  0xc2   : > { %996 = vmatmul.mubr.msk.f32.gmra.mxu0 %vm419_vm0, %v1424_v17 }
  0xc3   : > { %538 = vmatprep.mubr.f32.mxu0 %v1222_v25 }
  0xc6   : > { %997 = vmatmul.mubr.msk.f32.gmra.mxu0 %vm419_vm0, %v1432_v18 }
  0xc7   : > { %544 = vmatprep.mubr.f32.mxu0 %v1222_v25 }
  0xca   : > { %998 = vmatmul.mubr.msk.f32.gmra.mxu0 %vm419_vm0, %v1440_v19 }
  0xcb   : > { %550 = vmatprep.mubr.f32.mxu0 %v1222_v25 }
  0xce   : > { %999 = vmatmul.mubr.msk.f32.gmra.mxu0 %vm419_vm0, %v1448_v20 }
  0xcf   : > { %895 = vmatprep.mubr.f32.mxu0 %v1222_v25 }
 0x172   : > { %v510_v21 = vpop.f32.mrf.mxu0 }
 0x173   : > { %v511_v5 = vadd.f32 %v510_v21, %v1480_v0 }
 0x174   : > { %v512_v22 = vpop.f32.mrf.mxu0 }
 0x175   : > { %v513_v4 = vadd.f32 %v512_v22, %v1480_v0 }
 0x176   : > { %v516_v23 = vpop.f32.mrf.mxu0 }
 0x177   : > { %v517_v3 = vadd.f32 %v516_v23, %v1476_v59 }
 0x178   : > { %v518_v24 = vpop.f32.mrf.mxu0 }
 0x179   : > { %v519_v62 = vadd.f32 %v518_v24, %v1476_v59 }
 0x17a   : > { %v522_v26 = vpop.f32.mrf.mxu0 }
 0x17b   : > { %v523_v60 = vadd.f32 %v522_v26, %v1470_v54 }
 0x17c   : > { %v524_v27 = vpop.f32.mrf.mxu0 }
 0x17d   : > { %v525_v58 = vadd.f32 %v524_v27, %v1470_v54 }
 0x17e   : > { %v528_v28 = vpop.f32.mrf.mxu0 }
 0x17f   : > { %v529_v57 = vadd.f32 %v528_v28, %v1466_v49 }
 0x180   : > { %v530_v29 = vpop.f32.mrf.mxu0 }
 0x181   : > { %v531_v56 = vadd.f32 %v530_v29, %v1466_v49 }
 0x182   : > { %v534_v30 = vpop.f32.mrf.mxu0 }
 0x183   : > { %v535_v55 = vadd.f32 %v534_v30, %v1459_v42 }
 0x184   : > { %v536_v31 = vpop.f32.mrf.mxu0 }
 0x185   : > { %v537_v53 = vadd.f32 %v536_v31, %v1459_v42 }
 0x186   : > { %v540_v32 = vpop.f32.mrf.mxu0 }
 0x187   : > { %v541_v50 = vadd.f32 %v540_v32, %v1457_v40 }
 0x188   : > { %v542_v34 = vpop.f32.mrf.mxu0 }
 0x189   : > { %v543_v48 = vadd.f32 %v542_v34, %v1457_v40 }
 0x18a   : > { %v546_v38 = vpop.f32.mrf.mxu0 }
 0x18b   : > { %v547_v47 = vadd.f32 %v546_v38, %v1455_v35 }
 0x18c   : > { %v548_v39 = vpop.f32.mrf.mxu0 }
 0x18d   : > { %v549_v45 = vadd.f32 %v548_v39, %v1455_v35 }
 0x18e   : > { %v552_v41 = vpop.f32.mrf.mxu0 }
 0x18f   : > { %v553_v43 = vadd.f32 %v552_v41, %v1453_v33 }
 0x190   : > { %v554_v44 = vpop.f32.mrf.mxu0 }
 0x191   : > { %v555_v46 = vadd.f32 %v554_v44, %v1453_v33 }
 0x193   : > { %1079 = vtanh.f32 %v555_v46 }
 0x194   : > { %1081 = vtanh.f32 %v553_v43 }
 0x195   : > { %1083 = vtanh.f32 %v549_v45 }
 0x196   : > { %1085 = vtanh.f32 %v547_v47 }
 0x197   : > { %1087 = vtanh.f32 %v543_v48 }
 0x198   : > { %1089 = vtanh.f32 %v541_v50 }
 0x199   : > { %1091 = vtanh.f32 %v537_v53 }
 0x19a   : > { %1093 = vtanh.f32 %v535_v55 }
 0x19b   : > { %1095 = vtanh.f32 %v531_v56 }
 0x19c   : > { %1097 = vtanh.f32 %v529_v57 }
 0x19d   : > { %1099 = vtanh.f32 %v525_v58 }
 0x19e   : > { %1101 = vtanh.f32 %v523_v60 }
 0x19f   : > { %1103 = vtanh.f32 %v519_v62 }
 0x1a0   : > { %v1080_v6 = vpop.eup %1079  ;;  %1105 = vtanh.f32 %v517_v3 }
 0x1a1   : > { %v1082_v7 = vpop.eup %1081  ;;  %1107 = vtanh.f32 %v513_v4  ;;  %598 = vmatprep.subr.mxu1 %v1080_v6 }
 0x1a2   : > { %v1084_v8 = vpop.eup %1083  ;;  %1109 = vtanh.f32 %v511_v5  ;;  %599 = vmatpush1.msra.mxu1 %v1082_v7 }
 0x1a3   : > { %v1086_v9 = vpop.eup %1085  ;;  %1111 = vtanh.f32 %v1375_v37  ;;  %600 = vmatprep.subr.mxu1 %v1084_v8 }
 0x1a4   : > { %v1088_v10 = vpop.eup %1087  ;;  %1113 = vtanh.f32 %v1373_v36  ;;  %601 = vmatpush1.msra.mxu1 %v1086_v9 }
 0x1a5   : > { %v1090_v11 = vpop.eup %1089  ;;  %1115 = vtanh.f32 %v1379_v52  ;;  %602 = vmatprep.subr.mxu1 %v1088_v10 }
 0x1a6   : > { %v1092_v13 = vpop.eup %1091  ;;  %1117 = vtanh.f32 %v1377_v51  ;;  %603 = vmatpush1.msra.mxu1 %v1090_v11 }
 0x1a7   : > { %v1094_v21 = vpop.eup %1093  ;;  %1119 = vtanh.f32 %v1383_v63  ;;  %604 = vmatprep.subr.mxu1 %v1092_v13 }
 0x1a8   : > { %v1096_v22 = vpop.eup %1095  ;;  %1121 = vtanh.f32 %v1381_v61  ;;  %605 = vmatpush1.msra.mxu1 %v1094_v21  ;;  %v1496_v61 = vld [vmem:[%s1596_s5] sm:$0x3] }
 0x1a9   : > { %v1098_v37 = vpop.eup %1097  ;;  %1123 = vtanh.f32 %v1387_v2  ;;  %606 = vmatprep.subr.mxu1 %v1096_v22 }
 0x1aa   : > { %v1100_v36 = vpop.eup %1099  ;;  %1125 = vtanh.f32 %v1385_v1  ;;  %607 = vmatpush1.msra.mxu1 %v1098_v37 }
 0x1ab   : > { %v1102_v52 = vpop.eup %1101  ;;  %608 = vmatprep.subr.mxu1 %v1100_v36 }
 0x1ac   : > { %v1104_v51 = vpop.eup %1103  ;;  %609 = vmatpush1.msra.mxu1 %v1102_v52 }
 0x1ad   : > { %v1106_v23 = vpop.eup %1105  ;;  %610 = vmatprep.subr.mxu1 %v1104_v51 }
 0x1ae   : > { %v1108_v63 = vpop.eup %1107  ;;  %611 = vmatpush1.msra.mxu1 %v1106_v23 }
 0x1af   : > { %v1110_v2 = vpop.eup %1109  ;;  %612 = vmatprep.subr.mxu1 %v1108_v63 }
 0x1b0   : > { %v1112_v24 = vpop.eup %1111  ;;  %613 = vmatpush1.msra.mxu1 %v1110_v2 }
 0x1b1   : > { %v1114_v1 = vpop.eup %1113  ;;  %1000 = vmatmul.mubr.msk.f32.vlgmr.msra.gmra.mxu1 %vm578_vm1, %v1496_v61  ;;  %726 = vmatprep.subr.mxu1 %v1112_v24 }
 0x1b2   : > { %v1116_v26 = vpop.eup %1115  ;;  %727 = vmatpush1.msra.mxu1 %v1114_v1  ;;  %766 = vmatprep.mubr.f32.mxu1 %v1222_v25 }
 0x1b3   : > { %v1118_v27 = vpop.eup %1117  ;;  %728 = vmatprep.subr.mxu1 %v1116_v26 }
 0x1b4   : > { %v1120_v28 = vpop.eup %1119  ;;  %729 = vmatpush1.msra.mxu1 %v1118_v27 }
 0x1b5   : > { %v1122_v29 = vpop.eup %1121  ;;  %730 = vmatprep.subr.mxu1 %v1120_v28 }
 0x1b6   : > { %v1124_v30 = vpop.eup %1123  ;;  %731 = vmatpush1.msra.mxu1 %v1122_v29 }
 0x1b7   : > { %v1126_v31 = vpop.eup %1125  ;;  %732 = vmatprep.subr.mxu1 %v1124_v30 }
 0x1b8   : > { %733 = vmatpush1.msra.mxu1 %v1126_v31 }
 0x1b9   : > { %1003 = vmatmul.mubr.msk.f32.vlgmr.msra.gmra.mxu1 %vm419_vm0, %v1392_v12 }
 0x1ba   : > { %772 = vmatprep.mubr.f32.mxu1 %v1222_v25 }
 0x1bd   : > { %1004 = vmatmul.mubr.msk.f32.gmra.mxu1 %vm419_vm0, %v1400_v14  ;;  %v1527_v14 = vpop.permute.xlu0 %575 }
 0x1be   : > { %778 = vmatprep.mubr.f32.mxu1 %v1222_v25 }
 0x1c1   : > { %1005 = vmatmul.mubr.msk.f32.gmra.mxu1 %vm419_vm0, %v1408_v15 }
 0x1c2   : > { %784 = vmatprep.mubr.f32.mxu1 %v1222_v25 }
 0x1c5   : > { %1006 = vmatmul.mubr.msk.f32.gmra.mxu1 %vm419_vm0, %v1416_v16 }
 0x1c6   : > { %790 = vmatprep.mubr.f32.mxu1 %v1222_v25 }
 0x1c9   : > { %1007 = vmatmul.mubr.msk.f32.gmra.mxu1 %vm419_vm0, %v1424_v17 }
 0x1ca   : > { %796 = vmatprep.mubr.f32.mxu1 %v1222_v25 }
 0x1cd   : > { %1008 = vmatmul.mubr.msk.f32.gmra.mxu1 %vm419_vm0, %v1432_v18 }
 0x1ce   : > { %802 = vmatprep.mubr.f32.mxu1 %v1222_v25 }
 0x1d1   : > { %1009 = vmatmul.mubr.msk.f32.gmra.mxu1 %vm419_vm0, %v1440_v19 }
 0x1d2   : > { %808 = vmatprep.mubr.f32.mxu1 %v1222_v25 }
 0x1d5   : > { %1010 = vmatmul.mubr.msk.f32.gmra.mxu1 %vm419_vm0, %v1448_v20 }
 0x271   : > { %v648_v12 = vpop.f32.mrf.mxu1 }
 0x272   : > { %v649_v16 = vadd.f32 %v648_v12, %v1527_v14 }
 0x273   : > { %v650_v15 = vpop.f32.mrf.mxu1 }
 0x274   : > { %v651_v17 = vadd.f32 %v650_v15, %v1527_v14 }
 0x276   : > { %v655_v18 = vcombine.low %v649_v16, %v651_v17 }
 0x278   : > { %1001 = vst.sshfl [vmem:[%s1531_s16] sm:$0x33 pattern:$0x76325410] %v655_v18 }
 0x279   : > { %v768_v25 = vpop.f32.mrf.mxu1 }
 0x27a   : > { %v769_v8 = vadd.f32 %v768_v25, %v1480_v0 }
 0x27b   : > { %v770_v19 = vpop.f32.mrf.mxu1 }
 0x27d   : > { %v774_v32 = vpop.f32.mrf.mxu1 }
 0x27e   : > { %v775_v7 = vadd.f32 %v774_v32, %v1476_v59 }
 0x27f   : > { %v776_v20 = vpop.f32.mrf.mxu1 }
 0x281   : > { %v780_v34 = vpop.f32.mrf.mxu1 }
 0x283   : > { %v782_v38 = vpop.f32.mrf.mxu1 }
 0x285   : > { %v786_v39 = vpop.f32.mrf.mxu1 }
 0x286   : > { %v787_v6 = vadd.f32 %v786_v39, %v1466_v49 }
 0x287   : > { %v788_v41 = vpop.f32.mrf.mxu1 }
 0x288   : > { %v789_v5 = vadd.f32 %v788_v41, %v1466_v49 }
 0x289   : > { %v792_v43 = vpop.f32.mrf.mxu1 }
 0x28a   : > { %v793_v4 = vadd.f32 %v792_v43, %v1459_v42 }
 0x28b   : > { %v794_v44 = vpop.f32.mrf.mxu1 }
 0x28c   : > { %v795_v3 = vadd.f32 %v794_v44, %v1459_v42  ;;  %v771_v42 = vadd.f32 %v770_v19, %v1480_v0 }
 0x28d   : > { %v798_v45 = vpop.f32.mrf.mxu1 }
 0x28e   : > { %v799_v62 = vadd.f32 %v798_v45, %v1457_v40 }
 0x28f   : > { %v800_v46 = vpop.f32.mrf.mxu1 }
 0x290   : > { %v801_v60 = vadd.f32 %v800_v46, %v1457_v40  ;;  %v777_v40 = vadd.f32 %v776_v20, %v1476_v59 }
 0x291   : > { %v804_v47 = vpop.f32.mrf.mxu1 }
 0x292   : > { %v805_v58 = vadd.f32 %v804_v47, %v1455_v35 }
 0x293   : > { %v806_v48 = vpop.f32.mrf.mxu1 }
 0x294   : > { %v807_v56 = vadd.f32 %v806_v48, %v1455_v35  ;;  %v781_v35 = vadd.f32 %v780_v34, %v1470_v54 }
 0x295   : > { %v810_v50 = vpop.f32.mrf.mxu1 }
 0x296   : > { %v811_v53 = vadd.f32 %v810_v50, %v1453_v33 }
 0x297   : > { %v812_v55 = vpop.f32.mrf.mxu1 }
 0x298   : > { %v813_v57 = vadd.f32 %v812_v55, %v1453_v33  ;;  %v783_v33 = vadd.f32 %v782_v38, %v1470_v54 }
 0x29a   : > { %1127 = vtanh.f32 %v813_v57 }
 0x29b   : > { %1129 = vtanh.f32 %v811_v53 }
 0x29c   : > { %1131 = vtanh.f32 %v807_v56 }
 0x29d   : > { %1133 = vtanh.f32 %v805_v58 }
 0x29e   : > { %1135 = vtanh.f32 %v801_v60 }
 0x29f   : > { %1137 = vtanh.f32 %v799_v62 }
 0x2a0   : > { %1139 = vtanh.f32 %v795_v3 }
 0x2a1   : > { %1141 = vtanh.f32 %v793_v4 }
 0x2a2   : > { %1143 = vtanh.f32 %v789_v5 }
 0x2a3   : > { %1145 = vtanh.f32 %v787_v6 }
 0x2a4   : > { %1147 = vtanh.f32 %v783_v33 }
 0x2a5   : > { %1149 = vtanh.f32 %v781_v35 }
 0x2a6   : > { %1151 = vtanh.f32 %v777_v40 }
 0x2a7   : > { %v1128_v49 = vpop.eup %1127  ;;  %1153 = vtanh.f32 %v775_v7 }
 0x2a8   : > { %v1130_v9 = vpop.eup %1129  ;;  %1155 = vtanh.f32 %v771_v42  ;;  %847 = vmatprep.subr.mxu0 %v1128_v49 }
 0x2a9   : > { %v1132_v54 = vpop.eup %1131  ;;  %1157 = vtanh.f32 %v769_v8  ;;  %848 = vmatpush1.msra.mxu0 %v1130_v9 }
 0x2aa   : > { %v1134_v10 = vpop.eup %1133  ;;  %849 = vmatprep.subr.mxu0 %v1132_v54 }
 0x2ab   : > { %v1136_v11 = vpop.eup %1135  ;;  %850 = vmatpush1.msra.mxu0 %v1134_v10 }
 0x2ac   : > { %v1138_v59 = vpop.eup %1137  ;;  %851 = vmatprep.subr.mxu0 %v1136_v11 }
 0x2ad   : > { %v1140_v13 = vpop.eup %1139  ;;  %852 = vmatpush1.msra.mxu0 %v1138_v59 }
 0x2ae   : > { %v1142_v21 = vpop.eup %1141  ;;  %853 = vmatprep.subr.mxu0 %v1140_v13 }
 0x2af   : > { %v1144_v0 = vpop.eup %1143  ;;  %854 = vmatpush1.msra.mxu0 %v1142_v21 }
 0x2b0   : > { %v1146_v22 = vpop.eup %1145  ;;  %855 = vmatprep.subr.mxu0 %v1144_v0 }
 0x2b1   : > { %v1148_v37 = vpop.eup %1147  ;;  %856 = vmatpush1.msra.mxu0 %v1146_v22 }
 0x2b2   : > { %v1150_v36 = vpop.eup %1149  ;;  %857 = vmatprep.subr.mxu0 %v1148_v37 }
 0x2b3   : > { %v1152_v52 = vpop.eup %1151  ;;  %858 = vmatpush1.msra.mxu0 %v1150_v36 }
 0x2b4   : > { %v1154_v51 = vpop.eup %1153  ;;  %859 = vmatprep.subr.mxu0 %v1152_v52 }
 0x2b5   : > { %v1156_v23 = vpop.eup %1155  ;;  %860 = vmatpush1.msra.mxu0 %v1154_v51 }
 0x2b6   : > { %v1158_v63 = vpop.eup %1157  ;;  %861 = vmatprep.subr.mxu0 %v1156_v23 }
 0x2b7   : > { %862 = vmatpush1.msra.mxu0 %v1158_v63 }
 0x2b8   : > { %1011 = vmatmul.mubr.msk.f32.vlgmr.msra.gmra.mxu0 %vm578_vm1, %v1496_v61 }
 0x378   : > { %v897_v2 = vpop.f32.mrf.mxu0 }
 0x379   : > { %v898_v1 = vadd.f32 %v897_v2, %v1527_v14 }
 0x37a   : > { %v899_v24 = vpop.f32.mrf.mxu0 }
 0x37b   : > { %v900_v26 = vadd.f32 %v899_v24, %v1527_v14 }
 0x37d   : > { %v904_v27 = vcombine.low %v898_v1, %v900_v26 }
 0x37f   : > { %1018 = vst.sshfl [vmem:[%s1531_s16 + $0x4] sm:$0x33 pattern:$0x76325410] %v904_v27 }
 0x380   : > { %1172 = shalt.err (!%p1169_p3)
}
 0x381   : > { %s1173_s9 = scalar_lea.hbm %s928_s21, 128  ;;  %s1177_s15 = scalar_lea.hbm %s1598_s7, 256 }
 0x382   : > { %p1174_p4 = scmp.ne.s32.totalorder %s928_s21, %s1173_s9  ;;  %p1178_p9 = scmp.lt.s32.totalorder %s928_s21, %s1598_s7 }
 0x383   : > { %p1179_p10 = scmp.lt.s32.totalorder %s1177_s15, %s1173_s9 }
 0x384   : > { %p1175_p7 = pnand %p1174_p4, %p1302_p5 }
 0x385   : > { %p1180_p11 = por %p1179_p10, %p1178_p9 }
 0x386   : > { %p1176_p8 = pneg %p1175_p7 }
 0x388   : > { %p1181_p12 = pnand %p1180_p11, %p1176_p8 }
 0x38a   : > { %1184 = shalt.err (!%p1181_p12)
}
 0x38b   : > { %1020 = dma.vmem_to_hbm [thread:$0]  (%p1302_p5), %s931_s18, 128, %s928_s21, %s916_s22  }
 0x38c PF: > { %p1026_p13 = scmp.ge.s32.totalorder %s1219_s27, 2  ;;  %s942_s19 = sand.u32 1, %s1207_s24  }
 0x38d   : > { %s943_s20 = scalar_lea.sflag [#allocation3], %s942_s19 }
 0x38e   : > { %p1023_p0 = pnand %p1026_p13, %p1306_p6 }
 0x390   : > { %p1024_p1 = pneg %p1023_p0 }
 0x392   : > { %1202 = dma.done.wait (%p1024_p1), %s943_s20, 128  }
 0x393   : > { %1204 = vsyncadd (%p1024_p1), %s943_s20, 4294967168  ;;  %p17_p2 = scmp.ge.s32.totalorder %s1289_s30, 4   ;;  %s1601_s24 = smov %s1211_s25 }
 0x394   : > { %s1602_s25 = smov %s1215_s26  ;;  %s1603_s26 = smov %s1300_s10 }
 0x395   : > { %s1604_s27 = smov %s1289_s30  ;;  %19 = sbr.rel (!%p17_p2) target bundleno = 3 (0x3), region = 85 }
 0x39a   :  { %948 = vsyncpa [#allocation3], 1 }
 0x39b   :  { %950 = vsyncpa [#allocation3 + $0x1], 1 }

</bundles_post_ra>
